<compile_context>
chip_gen: v6e
topology: v6e:2x2x1
jax: 0.10.0
libtpu: 0.0.40
codegen_flags: <defaults>
</compile_context>

<pallas_src>
import functools

import jax
import jax.numpy as jnp
from jax.experimental import pallas as pl
from jax.experimental.pallas import tpu as pltpu

IN_DIM = 784
HID_DIM = 200
OUT_DIM = 10
HID_PAD = 256                 # lane-dense hidden width (MXU/vreg friendly)
OUT_PAD = 128                 # lane-dense width for the 2nd matmul / bias add
VMEM_LIMIT = 48 * 1024 * 1024  # headroom for 2048-row f32 x tiles (double-buffered)


def mlp_kernel(x_ref, w1_ref, b1_ref, w2_ref, b2_ref, o_ref):
    # x arrives in f32 straight from HBM (no wrapper-side pad/cast pass);
    # cast to bf16 in-register right before feeding the MXU.
    x = x_ref[...].astype(jnp.bfloat16)
    # (tm, 784) bf16 @ (784, 256) bf16 -> f32 accumulate, + f32 bias.
    h = jnp.dot(x, w1_ref[...], preferred_element_type=jnp.float32) + b1_ref[...]
    # LeakyReLU (PyTorch default negative_slope = 0.01), in f32.
    h = jnp.where(h > 0, h, 0.01 * h)
    # (tm, 256) bf16 @ (256, 128) bf16 -> f32, + f32 bias.
    z = jnp.dot(h.astype(jnp.bfloat16), w2_ref[...],
                preferred_element_type=jnp.float32) + b2_ref[...]
    # Sigmoid: exp + approximate reciprocal both run on the EUP slot.
    s = pl.reciprocal(1.0 + jnp.exp(-z), approx=True)
    # Store only the 10 real classes; output array is unpadded bf16.
    o_ref[...] = s[:, :OUT_DIM].astype(o_ref.dtype)


def _round_up(n, m):
    return ((n + m - 1) // m) * m


def _tensorcores_per_chip():
    """Best-effort TensorCores-per-chip (v4/v5p/v7x have 2). Tiling hint only."""
    try:
        kind = jax.devices()[0].device_kind.lower().replace(" ", "")
    except Exception:
        return 1
    return 2 if any(t in kind for t in ("v4", "v5p", "v7", "7x")) else 1


def _choose_tm(batch, tm_max, num_cores):
    """Batch-tile rows: multiple of 16, as large as allowed. Split across
    TensorCores only on multi-TC chips and only when each core still gets a
    reasonably large tile (>=256 rows); single-TC chips get one big tile."""
    b16 = _round_up(batch, 16)
    if num_cores >= 2 and b16 >= 512:
        return min(_round_up(pl.cdiv(b16, num_cores), 16), tm_max)
    return min(b16, tm_max)


@functools.partial(jax.jit, static_argnames=("tm",))
def _forward_impl(x, w1_p, b1_p, w2_p, b2_p, *, tm):
    B = x.shape[0]
    grid = (pl.cdiv(B, tm),)   # ragged last tile is masked by Pallas

    flops = 2 * B * (IN_DIM * HID_PAD + HID_PAD * OUT_PAD)
    bytes_accessed = (x.size * 4 + w1_p.size * 2 + w2_p.size * 2
                      + b1_p.size * 4 + b2_p.size * 4 + B * OUT_DIM * 2)

    return pl.pallas_call(
        mlp_kernel,
        out_shape=jax.ShapeDtypeStruct((B, OUT_DIM), jnp.bfloat16),
        grid_spec=pltpu.PrefetchScalarGridSpec(
            num_scalar_prefetch=0,
            grid=grid,
            in_specs=[
                pl.BlockSpec((tm, IN_DIM), lambda i: (i, 0)),        # x tile (streamed, f32)
                pl.BlockSpec((IN_DIM, HID_PAD), lambda i: (0, 0)),   # W1 (resident, bf16)
                pl.BlockSpec((1, HID_PAD), lambda i: (0, 0)),        # b1 (f32)
                pl.BlockSpec((HID_PAD, OUT_PAD), lambda i: (0, 0)),  # W2 (resident, bf16)
                pl.BlockSpec((1, OUT_PAD), lambda i: (0, 0)),        # b2 (f32)
            ],
            out_specs=pl.BlockSpec((tm, OUT_DIM), lambda i: (i, 0)),
        ),
        compiler_params=pltpu.CompilerParams(
            dimension_semantics=("parallel",),
            vmem_limit_bytes=VMEM_LIMIT,
        ),
        cost_estimate=pl.CostEstimate(
            flops=flops,
            transcendentals=B * OUT_PAD,
            bytes_accessed=bytes_accessed,
        ),
    )(x, w1_p, b1_p, w2_p, b2_p)


def classifier_forward(x, params, *, tm_max=2048):
    """x: (B, 784) f32; params: output of prepare_params. Returns (B, 10) bf16."""
    tm = _choose_tm(x.shape[0], tm_max, _tensorcores_per_chip())
    return _forward_impl(x, *params, tm=tm)


def init_params(key):
    """Deterministic init mimicking torch.nn.Linear default U[-1/sqrt(fan_in), +]."""
    k1, k2, k3, k4 = jax.random.split(key, 4)
    bound1 = 1.0 / jnp.sqrt(IN_DIM)
    bound2 = 1.0 / jnp.sqrt(HID_DIM)
    # Stored transposed relative to torch (in_features, out_features): y = x @ W + b.
    w1 = jax.random.uniform(k1, (IN_DIM, HID_DIM), jnp.float32, -bound1, bound1)
    b1 = jax.random.uniform(k2, (1, HID_DIM), jnp.float32, -bound1, bound1)
    w2 = jax.random.uniform(k3, (HID_DIM, OUT_DIM), jnp.float32, -bound2, bound2)
    b2 = jax.random.uniform(k4, (1, OUT_DIM), jnp.float32, -bound2, bound2)
    return w1, b1, w2, b2


def prepare_params(w1, b1, w2, b2):
    """One-time pad/cast of the weights to lane-dense, MXU-native layouts."""
    w1_p = jnp.pad(w1, ((0, 0), (0, HID_PAD - HID_DIM))).astype(jnp.bfloat16)
    b1_p = jnp.pad(b1, ((0, 0), (0, HID_PAD - HID_DIM))).astype(jnp.float32)
    w2_p = jnp.pad(w2, ((0, HID_PAD - HID_DIM),
                        (0, OUT_PAD - OUT_DIM))).astype(jnp.bfloat16)
    b2_p = jnp.pad(b2, ((0, 0), (0, OUT_PAD - OUT_DIM))).astype(jnp.float32)
    return w1_p, b1_p, w2_p, b2_p


def reference_forward(x, w1, b1, w2, b2):
    # Same dtype semantics as the kernel matmuls: bf16 inputs, f32 accumulation,
    # f32 elementwise epilogue (output of the kernel is additionally bf16-rounded).
    h = jnp.dot(x.astype(jnp.bfloat16), w1.astype(jnp.bfloat16),
                preferred_element_type=jnp.float32) + b1
    h = jnp.where(h > 0, h, 0.01 * h)
    z = jnp.dot(h.astype(jnp.bfloat16), w2.astype(jnp.bfloat16),
                preferred_element_type=jnp.float32) + b2
    return 1.0 / (1.0 + jnp.exp(-z))


# TODO(synk): BCELoss / SGD training loop (train, plot_progress) is host-side
# training logic, not part of the forward pass; only forward() is implemented.

if __name__ == "__main__":
    key = jax.random.PRNGKey(0)
    kx, kp = jax.random.split(key)
    w1, b1, w2, b2 = init_params(kp)
    params = prepare_params(w1, b1, w2, b2)

    # Small batch: single grid step, ragged batch edge (8 valid rows in a 16-row tile).
    B = 8
    x = jax.random.normal(kx, (B, IN_DIM), jnp.float32)
    out = jax.block_until_ready(classifier_forward(x, params))
    ref = reference_forward(x, w1, b1, w2, b2)
    assert out.shape == (B, OUT_DIM) and out.dtype == jnp.bfloat16
    assert jnp.allclose(out.astype(jnp.float32), ref, atol=8e-3), "mismatch vs reference (B=8)"

    # Non-aligned batch: exercises the masked batch edge in one larger tile.
    B2 = 40
    x2 = jax.random.normal(jax.random.PRNGKey(1), (B2, IN_DIM), jnp.float32)
    out2 = jax.block_until_ready(classifier_forward(x2, params))
    ref2 = reference_forward(x2, w1, b1, w2, b2)
    assert out2.shape == (B2, OUT_DIM)
    assert jnp.allclose(out2.astype(jnp.float32), ref2, atol=8e-3), "mismatch vs reference (B=40)"

    # Multi-step grid with a ragged last tile (small tm override keeps compile cheap).
    B3 = 300
    x3 = jax.random.normal(jax.random.PRNGKey(2), (B3, IN_DIM), jnp.float32)
    out3 = jax.block_until_ready(classifier_forward(x3, params, tm_max=128))
    ref3 = reference_forward(x3, w1, b1, w2, b2)
    assert out3.shape == (B3, OUT_DIM)
    assert jnp.allclose(out3.astype(jnp.float32), ref3, atol=8e-3), "mismatch vs reference (B=300)"

    print("KERNEL_OK")
</pallas_src>

<mosaic_0001>
module attributes {stable_mosaic.version = 11 : i64} {
  func.func @mlp_kernel(%arg0: i32, %arg1: memref<16x784xf32, #tpu.memory_space<vmem>>, %arg2: memref<784x256xbf16, #tpu.memory_space<vmem>>, %arg3: memref<1x256xf32, #tpu.memory_space<vmem>>, %arg4: memref<256x128xbf16, #tpu.memory_space<vmem>>, %arg5: memref<1x128xf32, #tpu.memory_space<vmem>>, %arg6: memref<16x10xbf16, #tpu.memory_space<vmem>>) attributes {dimension_semantics = [#tpu.dimension_semantics<parallel>], iteration_bounds = array<i64: 1>, scalar_prefetch = 0 : i64, scratch_operands = 0 : i64, tpu.core_type = #tpu.core_type<tc>, window_params = [{transform_indices = @transform_0, window_bounds = array<i64: 16, 784>}, {pipeline_mode = #tpu.pipeline_mode<synchronous>, transform_indices = @transform_1, window_bounds = array<i64: 784, 256>}, {pipeline_mode = #tpu.pipeline_mode<synchronous>, transform_indices = @transform_2, window_bounds = array<i64: 1, 256>}, {pipeline_mode = #tpu.pipeline_mode<synchronous>, transform_indices = @transform_3, window_bounds = array<i64: 256, 128>}, {pipeline_mode = #tpu.pipeline_mode<synchronous>, transform_indices = @transform_4, window_bounds = array<i64: 1, 128>}, {transform_indices = @transform_5, window_bounds = array<i64: 16, 10>}]} {
    %c0 = arith.constant 0 : index
    %c0_0 = arith.constant 0 : index
    %0 = vector.load %arg1[%c0, %c0_0] : memref<16x784xf32, #tpu.memory_space<vmem>>, vector<16x784xf32>
    %1 = arith.truncf %0 : vector<16x784xf32> to vector<16x784xbf16>
    %c0_1 = arith.constant 0 : index
    %c0_2 = arith.constant 0 : index
    %2 = vector.load %arg2[%c0_1, %c0_2] : memref<784x256xbf16, #tpu.memory_space<vmem>>, vector<784x256xbf16>
    %cst = arith.constant dense<0.000000e+00> : vector<16x256xf32>
    %3 = tpu.matmul %1, %2, %cst {dimension_numbers = #tpu.dot_dimension_numbers<[1], [0], [0], [1], [0, 0, 1, 1], [], []>} : vector<16x784xbf16>, vector<784x256xbf16>, vector<16x256xf32> -> vector<16x256xf32>
    %c0_3 = arith.constant 0 : index
    %c0_4 = arith.constant 0 : index
    %4 = vector.load %arg3[%c0_3, %c0_4] : memref<1x256xf32, #tpu.memory_space<vmem>>, vector<1x256xf32>
    %5 = vector.broadcast %4 : vector<1x256xf32> to vector<16x256xf32>
    %6 = arith.addf %3, %5 : vector<16x256xf32>
    %cst_5 = arith.constant 0.000000e+00 : f32
    %7 = vector.broadcast %cst_5 : f32 to vector<16x256xf32>
    %8 = arith.cmpf ogt, %6, %7 : vector<16x256xf32>
    %cst_6 = arith.constant 0.00999999977 : f32
    %9 = vector.broadcast %cst_6 : f32 to vector<16x256xf32>
    %10 = arith.mulf %9, %6 : vector<16x256xf32>
    %11 = arith.select %8, %6, %10 : vector<16x256xi1>, vector<16x256xf32>
    %12 = arith.truncf %11 : vector<16x256xf32> to vector<16x256xbf16>
    %c0_7 = arith.constant 0 : index
    %c0_8 = arith.constant 0 : index
    %13 = vector.load %arg4[%c0_7, %c0_8] : memref<256x128xbf16, #tpu.memory_space<vmem>>, vector<256x128xbf16>
    %cst_9 = arith.constant dense<0.000000e+00> : vector<16x128xf32>
    %14 = tpu.matmul %12, %13, %cst_9 {dimension_numbers = #tpu.dot_dimension_numbers<[1], [0], [0], [1], [0, 0, 1, 1], [], []>} : vector<16x256xbf16>, vector<256x128xbf16>, vector<16x128xf32> -> vector<16x128xf32>
    %c0_10 = arith.constant 0 : index
    %c0_11 = arith.constant 0 : index
    %15 = vector.load %arg5[%c0_10, %c0_11] : memref<1x128xf32, #tpu.memory_space<vmem>>, vector<1x128xf32>
    %16 = vector.broadcast %15 : vector<1x128xf32> to vector<16x128xf32>
    %17 = arith.addf %14, %16 : vector<16x128xf32>
    %cst_12 = arith.constant 0.000000e+00 : f32
    %18 = vector.broadcast %cst_12 : f32 to vector<16x128xf32>
    %19 = arith.subf %18, %17 : vector<16x128xf32>
    %20 = math.exp %19 : vector<16x128xf32>
    %cst_13 = arith.constant 1.000000e+00 : f32
    %21 = vector.broadcast %cst_13 : f32 to vector<16x128xf32>
    %22 = arith.addf %21, %20 : vector<16x128xf32>
    %23 = tpu.reciprocal %22 {approx = true} : vector<16x128xf32> -> vector<16x128xf32>
    %24 = vector.extract_strided_slice %23 {offsets = [0, 0], sizes = [16, 10], strides = [1, 1]} : vector<16x128xf32> to vector<16x10xf32>
    %25 = arith.truncf %24 : vector<16x10xf32> to vector<16x10xbf16>
    %c0_14 = arith.constant 0 : index
    %c0_15 = arith.constant 0 : index
    %26 = vector.load %arg6[%c0_14, %c0_15] : memref<16x10xbf16, #tpu.memory_space<vmem>>, vector<16x10xbf16>
    tpu.vector_store %arg6[%c0_14, %c0_15], %25 {strides = array<i32>} : memref<16x10xbf16, #tpu.memory_space<vmem>>, vector<16x10xbf16>,
    return
  }
  func.func @transform_0(%arg0: i32) -> (i32, i32) {
    %c0_i32 = arith.constant 0 : i32
    %c0_i32_0 = arith.constant 0 : i32
    return %arg0, %c0_i32 : i32, i32
  }
  func.func @transform_1(%arg0: i32) -> (i32, i32) {
    %c0_i32 = arith.constant 0 : i32
    %c0_i32_0 = arith.constant 0 : i32
    %c0_i32_1 = arith.constant 0 : i32
    return %c0_i32, %c0_i32_0 : i32, i32
  }
  func.func @transform_2(%arg0: i32) -> (i32, i32) {
    %c0_i32 = arith.constant 0 : i32
    %c0_i32_0 = arith.constant 0 : i32
    %c0_i32_1 = arith.constant 0 : i32
    return %c0_i32, %c0_i32_0 : i32, i32
  }
  func.func @transform_3(%arg0: i32) -> (i32, i32) {
    %c0_i32 = arith.constant 0 : i32
    %c0_i32_0 = arith.constant 0 : i32
    %c0_i32_1 = arith.constant 0 : i32
    return %c0_i32, %c0_i32_0 : i32, i32
  }
  func.func @transform_4(%arg0: i32) -> (i32, i32) {
    %c0_i32 = arith.constant 0 : i32
    %c0_i32_0 = arith.constant 0 : i32
    %c0_i32_1 = arith.constant 0 : i32
    return %c0_i32, %c0_i32_0 : i32, i32
  }
  func.func @transform_5(%arg0: i32) -> (i32, i32) {
    %c0_i32 = arith.constant 0 : i32
    %c0_i32_0 = arith.constant 0 : i32
    return %arg0, %c0_i32 : i32, i32
  }
}

</mosaic_0001>

<bundles_post_ra>
// kernel: _forward_impl.1
= control target key start
LH: loop header
LB: loop body
LE: loop exit
PB: predicated region body
PF: predicated region fallthrough
CT: control target
= control target key end

     0   :  { %10 = vsyncpa [#allocation3], 0  ;;  %s1564_s0 = inlined_call_operand.hbm [shape: f32[8,784], index: 0, kind: input, shape index: {}]   ;;  %s1565_s1 = inlined_call_operand.hbm [shape: bf16[784,256], index: 1, kind: input, shape index: {}]   ;;  %s1566_s2 = inlined_call_operand.vmem [shape: f32[1,256], index: 2, kind: input, shape index: {}]   ;;  %s1567_s3 = inlined_call_operand.hbm [shape: bf16[256,128], index: 3, kind: input, shape index: {}]   ;;  %s1568_s4 = inlined_call_operand.vmem [shape: f32[1,128], index: 4, kind: input, shape index: {}]   ;;  %s1569_s5 = inlined_call_operand.hbm [shape: bf16[8,10], index: 5, kind: output, shape index: {}]  }
   0x1   :  { %11 = vsyncpa [#allocation6], 0 }
   0x2   :  { %12 = vsyncpa [#allocation4], 0 }
   0x3   :  { %17 = vsyncadd [#allocation3], 896  ;;  %s1499_s18 = smov [#allocation5]  }
   0x4   :  { %s30_s19 = sshll.u32 %s1499_s18, 4  ;;  %s31_s19 = int_to_ptr.vmem [resolvable:$true] %s30_s19 }
   0x5   :  { %s1421_s20 = scalar_lea.vmem %s31_s19, 12544  ;;  %p1426_p1 = scmp.lt.s32.totalorder %s31_s19, %s31_s19 }
   0x6   :  { %p1422_p0 = scmp.ne.s32.totalorder %s31_s19, %s1421_s20  ;;  %p1427_p2 = scmp.lt.s32.totalorder %s1421_s20, %s1421_s20 }
   0x8   :  { %p1428_p3 = por %p1427_p2, %p1426_p1 }
   0xa   :  { %p1429_p4 = pnand %p1428_p3, %p1422_p0 }
   0xc   :  { %1432 = shalt.err (!%p1429_p4)
}
   0xd   :  { %s1500_s21 = smov 128   ;;  %s1501_s22 = smov 8  }
   0xe   :  { %36 = dma.hbm_to_vmem [thread:$0]  %s1565_s1, 12544, %s31_s19, [#allocation6], %s1500_s21, %s1500_s21, %s1501_s22  }
   0xf   :  { %s1502_s25 = smov [#allocation2]  }
  0x10   :  { %s18_s26 = sshll.u32 %s1502_s25, 4  ;;  %s19_s26 = int_to_ptr.vmem [resolvable:$true] %s18_s26 }
  0x11   :  { %s1441_s27 = scalar_lea.vmem %s19_s26, 896  ;;  %s1445_s28 = scalar_lea.vmem %s19_s26, 1792 }
  0x12   :  { %p1442_p5 = scmp.ne.s32.totalorder %s19_s26, %s1441_s27  ;;  %p1446_p6 = scmp.lt.s32.totalorder %s19_s26, %s19_s26 }
  0x13   :  { %p1447_p7 = scmp.lt.s32.totalorder %s1445_s28, %s1441_s27 }
  0x15   :  { %p1448_p8 = por %p1447_p7, %p1446_p6 }
  0x17   :  { %p1449_p9 = pnand %p1448_p8, %p1442_p5 }
  0x19   :  { %1452 = shalt.err (!%p1449_p9)
}
  0x1a   :  { %s1503_s29 = smov 896   ;;  %s1504_s30 = smov 56  }
  0x1b   :  { %24 = dma.hbm_to_vmem [thread:$0]  %s1564_s0, 896, %s19_s26, [#allocation3], %s1503_s29, %s1503_s29, %s1504_s30  }
  0x1c   :  { %s1505_s8 = smov [#allocation7]  }
  0x1d   :  { %s44_s9 = sshll.u32 %s1505_s8, 4  ;;  %s45_s9 = int_to_ptr.vmem [resolvable:$true] %s44_s9 }
  0x1e   :  { %s1461_s1 = scalar_lea.vmem %s45_s9, 2048  ;;  %p1466_p11 = scmp.lt.s32.totalorder %s45_s9, %s45_s9 }
  0x1f   :  { %p1462_p10 = scmp.ne.s32.totalorder %s45_s9, %s1461_s1  ;;  %p1467_p12 = scmp.lt.s32.totalorder %s1461_s1, %s1461_s1 }
  0x21   :  { %p1468_p13 = por %p1467_p12, %p1466_p11 }
  0x23   :  { %p1469_p0 = pnand %p1468_p13, %p1462_p10 }
  0x25   :  { %1472 = shalt.err (!%p1469_p0)
}
  0x26   :  { %s1506_s10 = smov 64   ;;  %s1507_s11 = smov 4  }
  0x27   :  { %50 = dma.hbm_to_vmem [thread:$0]  %s1567_s3, 2048, %s45_s9, [#allocation6], %s1506_s10, %s1506_s10, %s1507_s11  }
  0x28   :  { %1493 = dma.done.wait [#allocation3], 1792  }
  0x29   :  { %1494 = vsyncadd [#allocation3], 4294965504 }
  0x2a   :  { %1495 = dma.done.wait [#allocation6], 14592  }
  0x2b   :  { %1496 = vsyncadd [#allocation6], 4294952704  ;;  %v1242_v0 = vld [vmem:[#allocation5 + $0x74] ss:$8 sps:$4 sm:$0xff]   ;;  %v1244_v1 = vld [vmem:[#allocation5 + $0x70] ss:$8 sps:$4 sm:$0xff]  }
  0x2c   :  { %688 = vmatprep.subr.bf16.mxu0 %v1242_v0  ;;  %v1245_v2 = vld [vmem:[#allocation5 + $0x174] ss:$8 sps:$4 sm:$0xff]   ;;  %v1247_v3 = vld [vmem:[#allocation5 + $0x170] ss:$8 sps:$4 sm:$0xff]   ;;  %v1248_v4 = vld [vmem:[#allocation5 + $0x64] ss:$8 sps:$4 sm:$0xff]  }
  0x2d   :  { %689 = vmatpush1.bf16.msra.mxu0 %v1244_v1  ;;  %v1250_v5 = vld [vmem:[#allocation5 + $0x60] ss:$8 sps:$4 sm:$0xff]   ;;  %731 = vmatprep.subr.bf16.mxu1 %v1245_v2  ;;  %v1251_v6 = vld [vmem:[#allocation5 + $0x164] ss:$8 sps:$4 sm:$0xff]   ;;  %v1254_v8 = vld [vmem:[#allocation5 + $0x54] ss:$8 sps:$4 sm:$0xff]  }
  0x2e   :  { %732 = vmatpush1.bf16.msra.mxu1 %v1247_v3  ;;  %690 = vmatprep.subr.bf16.mxu0 %v1248_v4  ;;  %v1253_v7 = vld [vmem:[#allocation5 + $0x160] ss:$8 sps:$4 sm:$0xff]   ;;  %v1256_v9 = vld [vmem:[#allocation5 + $0x50] ss:$8 sps:$4 sm:$0xff]   ;;  %v1257_v10 = vld [vmem:[#allocation5 + $0x154] ss:$8 sps:$4 sm:$0xff]  }
  0x2f   :  { %733 = vmatprep.subr.bf16.mxu1 %v1251_v6  ;;  %v1260_v11 = vld [vmem:[#allocation5 + $0x44] ss:$8 sps:$4 sm:$0xff]   ;;  %v1259_v12 = vld [vmem:[#allocation5 + $0x150] ss:$8 sps:$4 sm:$0xff]   ;;  %v1262_v14 = vld [vmem:[#allocation5 + $0x40] ss:$8 sps:$4 sm:$0xff]  }
  0x30   :  { %v1263_v13 = vld [vmem:[#allocation5 + $0x144] ss:$8 sps:$4 sm:$0xff]   ;;  %v1266_v15 = vld [vmem:[#allocation5 + $0x34] ss:$8 sps:$4 sm:$0xff]   ;;  %v1265_v16 = vld [vmem:[#allocation5 + $0x140] ss:$8 sps:$4 sm:$0xff]  }
  0x31   :  { %691 = vmatpush1.bf16.msra.mxu0 %v1250_v5  ;;  %v1269_v17 = vld [vmem:[#allocation5 + $0x134] ss:$8 sps:$4 sm:$0xff]   ;;  %v1268_v18 = vld [vmem:[#allocation5 + $0x30] ss:$8 sps:$4 sm:$0xff]   ;;  %v1272_v19 = vld [vmem:[#allocation5 + $0x24] ss:$8 sps:$4 sm:$0xff]  }
  0x32   :  { %692 = vmatprep.subr.bf16.mxu0 %v1254_v8  ;;  %734 = vmatpush1.bf16.msra.mxu1 %v1253_v7  ;;  %v1271_v20 = vld [vmem:[#allocation5 + $0x130] ss:$8 sps:$4 sm:$0xff]   ;;  %v1275_v21 = vld [vmem:[#allocation5 + $0x124] ss:$8 sps:$4 sm:$0xff]   ;;  %v1274_v22 = vld [vmem:[#allocation5 + $0x20] ss:$8 sps:$4 sm:$0xff]  }
  0x33   :  { %735 = vmatprep.subr.bf16.mxu1 %v1257_v10  ;;  %v1278_v23 = vld [vmem:[#allocation5 + $0x14] ss:$8 sps:$4 sm:$0xff]   ;;  %v1277_v24 = vld [vmem:[#allocation5 + $0x120] ss:$8 sps:$4 sm:$0xff]   ;;  %v1280_v26 = vld [vmem:[#allocation5 + $0x10] ss:$8 sps:$4 sm:$0xff]  }
  0x34   :  { %v1281_v25 = vld [vmem:[#allocation5 + $0x114] ss:$8 sps:$4 sm:$0xff]   ;;  %v1284_v27 = vld [vmem:[#allocation5 + $0x4] ss:$8 sps:$4 sm:$0xff]   ;;  %v1283_v28 = vld [vmem:[#allocation5 + $0x110] ss:$8 sps:$4 sm:$0xff]  }
  0x35   :  { %693 = vmatpush1.bf16.msra.mxu0 %v1256_v9  ;;  %v1287_v29 = vld [vmem:[#allocation5 + $0x104] ss:$8 sps:$4 sm:$0xff]   ;;  %v1286_v30 = vld [vmem:[#allocation5] ss:$8 sps:$4 sm:$0xff]   ;;  %v1290_v31 = vld [vmem:[#allocation5 + $0xf4] ss:$8 sps:$4 sm:$0xff]  }
  0x36   :  { %694 = vmatprep.subr.bf16.mxu0 %v1260_v11  ;;  %736 = vmatpush1.bf16.msra.mxu1 %v1259_v12  ;;  %v1289_v32 = vld [vmem:[#allocation5 + $0x100] ss:$8 sps:$4 sm:$0xff]   ;;  %v1293_v33 = vld [vmem:[#allocation5 + $0x1f4] ss:$8 sps:$4 sm:$0xff]   ;;  %v1292_v34 = vld [vmem:[#allocation5 + $0xf0] ss:$8 sps:$4 sm:$0xff]  }
  0x37   :  { %737 = vmatprep.subr.bf16.mxu1 %v1263_v13  ;;  %v1296_v35 = vld [vmem:[#allocation5 + $0xe4] ss:$8 sps:$4 sm:$0xff]   ;;  %v1295_v36 = vld [vmem:[#allocation5 + $0x1f0] ss:$8 sps:$4 sm:$0xff]   ;;  %v1298_v38 = vld [vmem:[#allocation5 + $0xe0] ss:$8 sps:$4 sm:$0xff]  }
  0x38   :  { %v1299_v37 = vld [vmem:[#allocation5 + $0x1e4] ss:$8 sps:$4 sm:$0xff]   ;;  %v1302_v39 = vld [vmem:[#allocation5 + $0xd4] ss:$8 sps:$4 sm:$0xff]   ;;  %v1301_v40 = vld [vmem:[#allocation5 + $0x1e0] ss:$8 sps:$4 sm:$0xff]  }
  0x39   :  { %695 = vmatpush1.bf16.msra.mxu0 %v1262_v14  ;;  %v1305_v41 = vld [vmem:[#allocation5 + $0x1d4] ss:$8 sps:$4 sm:$0xff]   ;;  %v1304_v42 = vld [vmem:[#allocation5 + $0xd0] ss:$8 sps:$4 sm:$0xff]   ;;  %v1308_v43 = vld [vmem:[#allocation5 + $0xc4] ss:$8 sps:$4 sm:$0xff]  }
  0x3a   :  { %696 = vmatprep.subr.bf16.mxu0 %v1266_v15  ;;  %738 = vmatpush1.bf16.msra.mxu1 %v1265_v16  ;;  %v1307_v44 = vld [vmem:[#allocation5 + $0x1d0] ss:$8 sps:$4 sm:$0xff]   ;;  %v1311_v45 = vld [vmem:[#allocation5 + $0x1c4] ss:$8 sps:$4 sm:$0xff]   ;;  %v1310_v48 = vld [vmem:[#allocation5 + $0xc0] ss:$8 sps:$4 sm:$0xff]  }
  0x3b   :  { %739 = vmatprep.subr.bf16.mxu1 %v1269_v17  ;;  %v64_v46 = vld [vmem:[#allocation2 + $0x8] sm:$0xff]  ;;  %v71_v47 = vld [vmem:[#allocation2 + $0x40] sm:$0xff]  ;;  %v1313_v51 = vld [vmem:[#allocation5 + $0x1c0] ss:$8 sps:$4 sm:$0xff]   ;;  %vm684_vm0 = vcmask 130048   ;;  %vm1068_vm5 = vcmask 76800  }
  0x3c   :  { %v78_v49 = vpack.c.bf16 %v71_v47, %v64_v46  ;;  %v1314_v50 = vld [vmem:[#allocation5 + $0xb4] ss:$8 sps:$4 sm:$0xff]   ;;  %v66_v52 = vld [vmem:[#allocation2 + $0x18] sm:$0xff]  ;;  %v73_v53 = vld [vmem:[#allocation2 + $0x50] sm:$0xff] }
  0x3d   :  { %697 = vmatpush1.bf16.msra.mxu0 %v1268_v18  ;;  %v1317_v54 = vld [vmem:[#allocation5 + $0x1b4] ss:$8 sps:$4 sm:$0xff]   ;;  %v80_v55 = vpack.c.bf16 %v73_v53, %v66_v52  ;;  %v1316_v56 = vld [vmem:[#allocation5 + $0xb0] ss:$8 sps:$4 sm:$0xff]   ;;  %v1320_v57 = vld [vmem:[#allocation5 + $0xa4] ss:$8 sps:$4 sm:$0xff]  }
  0x3e   :  { %698 = vmatprep.subr.bf16.mxu0 %v1272_v19  ;;  %740 = vmatpush1.bf16.msra.mxu1 %v1271_v20  ;;  %v1319_v58 = vld [vmem:[#allocation5 + $0x1b0] ss:$8 sps:$4 sm:$0xff]   ;;  %v1323_v59 = vld [vmem:[#allocation5 + $0x1a4] ss:$8 sps:$4 sm:$0xff]   ;;  %v1322_v60 = vld [vmem:[#allocation5 + $0xa0] ss:$8 sps:$4 sm:$0xff]  }
  0x3f   :  { %741 = vmatprep.subr.bf16.mxu1 %v1275_v21  ;;  %720 = vmatprep.mubr.bf16.mxu0 %v78_v49  ;;  %v1326_v61 = vld [vmem:[#allocation5 + $0x94] ss:$8 sps:$4 sm:$0xff]   ;;  %v1325_v62 = vld [vmem:[#allocation5 + $0x1a0] ss:$8 sps:$4 sm:$0xff]   ;;  %v1328_v0 = vld [vmem:[#allocation5 + $0x90] ss:$8 sps:$4 sm:$0xff]  }
  0x40   :  { %763 = vmatprep.mubr.bf16.mxu1 %v80_v55  ;;  %v1329_v63 = vld [vmem:[#allocation5 + $0x194] ss:$8 sps:$4 sm:$0xff]   ;;  %v1331_v1 = vld [vmem:[#allocation5 + $0x190] ss:$8 sps:$4 sm:$0xff]   ;;  %v1332_v2 = vld [vmem:[#allocation5 + $0x84] ss:$8 sps:$4 sm:$0xff]  }
  0x41   :  { %699 = vmatpush1.bf16.msra.mxu0 %v1274_v22  ;;  %v1334_v3 = vld [vmem:[#allocation5 + $0x80] ss:$8 sps:$4 sm:$0xff]   ;;  %v1335_v4 = vld [vmem:[#allocation5 + $0x184] ss:$8 sps:$4 sm:$0xff]   ;;  %v63_v5 = vld [vmem:[#allocation2] sm:$0xff]  ;;  %v1508_v21 = vmov 0  }
  0x42   :  { %700 = vmatprep.subr.bf16.mxu0 %v1278_v23  ;;  %742 = vmatpush1.bf16.msra.mxu1 %v1277_v24  ;;  %v1337_v6 = vld [vmem:[#allocation5 + $0x180] ss:$8 sps:$4 sm:$0xff]   ;;  %v1340_v8 = vld [vmem:[#allocation5 + $0x274] ss:$8 sps:$4 sm:$0xff]   ;;  %v1338_v12 = vld [vmem:[#allocation5 + $0x270] ss:$8 sps:$4 sm:$0xff]  }
  0x43   :  { %743 = vmatprep.subr.bf16.mxu1 %v1281_v25  ;;  %v70_v7 = vld [vmem:[#allocation2 + $0x38] sm:$0xff]  ;;  %v65_v9 = vld [vmem:[#allocation2 + $0x10] sm:$0xff]  ;;  %v72_v10 = vld [vmem:[#allocation2 + $0x48] sm:$0xff] }
  0x44   :  { %v77_v11 = vpack.c.bf16 %v70_v7, %v63_v5  ;;  %v79_v13 = vpack.c.bf16 %v72_v10, %v65_v9  ;;  %v1343_v14 = vld [vmem:[#allocation5 + $0x264] ss:$8 sps:$4 sm:$0xff]   ;;  %v1383_v15 = vld [vmem:[#allocation5 + $0x300] ss:$8 sps:$4 sm:$0xff]   ;;  %v1346_v18 = vld [vmem:[#allocation5 + $0x254] ss:$8 sps:$4 sm:$0xff]  }
  0x45   :  { %701 = vmatpush1.bf16.msra.mxu0 %v1280_v26  ;;  %v1385_v16 = vld [vmem:[#allocation5 + $0x304] ss:$8 sps:$4 sm:$0xff]   ;;  %v1341_v17 = vld [vmem:[#allocation5 + $0x260] ss:$8 sps:$4 sm:$0xff]   ;;  %v68_v19 = vld [vmem:[#allocation2 + $0x28] sm:$0xff] }
  0x46   :  { %702 = vmatprep.subr.bf16.mxu0 %v1284_v27  ;;  %744 = vmatpush1.bf16.msra.mxu1 %v1283_v28  ;;  %v1344_v20 = vld [vmem:[#allocation5 + $0x250] ss:$8 sps:$4 sm:$0xff]   ;;  %v69_v22 = vld [vmem:[#allocation2 + $0x30] sm:$0xff]  ;;  %v1382_v49 = vld [vmem:[#allocation5 + $0x294] ss:$8 sps:$4 sm:$0xff]  }
  0x47   :  { %745 = vmatprep.subr.bf16.mxu1 %v1287_v29  ;;  %v76_v23 = vld [vmem:[#allocation2 + $0x68] sm:$0xff]  ;;  %v75_v24 = vld [vmem:[#allocation2 + $0x60] sm:$0xff]  ;;  %v1349_v25 = vld [vmem:[#allocation5 + $0x244] ss:$8 sps:$4 sm:$0xff]  }
  0x48   :  { %v82_v26 = vpack.c.bf16 %v75_v24, %v68_v19  ;;  %v83_v27 = vpack.c.bf16 %v76_v23, %v69_v22  ;;  %v1347_v28 = vld [vmem:[#allocation5 + $0x240] ss:$8 sps:$4 sm:$0xff]   ;;  %v1352_v29 = vld [vmem:[#allocation5 + $0x234] ss:$8 sps:$4 sm:$0xff]   ;;  %v1374_v46 = vld [vmem:[#allocation5 + $0x2b0] ss:$8 sps:$4 sm:$0xff]  }
  0x49   :  { %703 = vmatpush1.bf16.msra.mxu0 %v1286_v30  ;;  %v1350_v30 = vld [vmem:[#allocation5 + $0x230] ss:$8 sps:$4 sm:$0xff]   ;;  %v1379_v47 = vld [vmem:[#allocation5 + $0x2a4] ss:$8 sps:$4 sm:$0xff]   ;;  %v1386_v52 = vld [vmem:[#allocation5 + $0x280] ss:$8 sps:$4 sm:$0xff]  }
  0x4a   :  { %704 = vmatprep.subr.bf16.mxu0 %v1290_v31  ;;  %746 = vmatpush1.bf16.msra.mxu1 %v1289_v32  ;;  %v1355_v31 = vld [vmem:[#allocation5 + $0x224] ss:$8 sps:$4 sm:$0xff]   ;;  %v1353_v32 = vld [vmem:[#allocation5 + $0x220] ss:$8 sps:$4 sm:$0xff]   ;;  %v67_v53 = vld [vmem:[#allocation2 + $0x20] sm:$0xff] }
  0x4b   :  { %747 = vmatprep.subr.bf16.mxu1 %v1293_v33  ;;  %v1358_v33 = vld [vmem:[#allocation5 + $0x214] ss:$8 sps:$4 sm:$0xff]  }
  0x4c   :  { %v1402_v5 = vld [vmem:[#allocation7 + $0x8] sm:$0xff]   ;;  %v1404_v7 = vld [vmem:[#allocation7] sm:$0xff]  }
  0x4d   :  { %705 = vmatpush2.bf16.msra.mxu0 %v1292_v34  ;;  %v1356_v34 = vld [vmem:[#allocation5 + $0x210] ss:$8 sps:$4 sm:$0xff]  }
  0x4e   :  { %706 = vmatprep.subr.bf16.mxu0 %v1296_v35  ;;  %748 = vmatpush2.bf16.msra.mxu1 %v1295_v36  ;;  %v1361_v35 = vld [vmem:[#allocation5 + $0x204] ss:$8 sps:$4 sm:$0xff]   ;;  %v1359_v36 = vld [vmem:[#allocation5 + $0x200] ss:$8 sps:$4 sm:$0xff]  }
  0x4f   :  { %749 = vmatprep.subr.bf16.mxu1 %v1299_v37  ;;  %v1364_v37 = vld [vmem:[#allocation5 + $0x2f4] ss:$8 sps:$4 sm:$0xff]  }
  0x51   :  { %707 = vmatpush2.bf16.msra.mxu0 %v1298_v38  ;;  %v1362_v38 = vld [vmem:[#allocation5 + $0x2f0] ss:$8 sps:$4 sm:$0xff]  }
  0x52   :  { %708 = vmatprep.subr.bf16.mxu0 %v1302_v39  ;;  %750 = vmatpush2.bf16.msra.mxu1 %v1301_v40  ;;  %v1367_v39 = vld [vmem:[#allocation5 + $0x2e4] ss:$8 sps:$4 sm:$0xff]   ;;  %v1365_v40 = vld [vmem:[#allocation5 + $0x2e0] ss:$8 sps:$4 sm:$0xff]  }
  0x53   :  { %751 = vmatprep.subr.bf16.mxu1 %v1305_v41  ;;  %v1370_v41 = vld [vmem:[#allocation5 + $0x2d4] ss:$8 sps:$4 sm:$0xff]  }
  0x55   :  { %709 = vmatpush2.bf16.msra.mxu0 %v1304_v42  ;;  %v1368_v42 = vld [vmem:[#allocation5 + $0x2d0] ss:$8 sps:$4 sm:$0xff]  }
  0x56   :  { %710 = vmatprep.subr.bf16.mxu0 %v1308_v43  ;;  %752 = vmatpush2.bf16.msra.mxu1 %v1307_v44  ;;  %v1373_v43 = vld [vmem:[#allocation5 + $0x2c4] ss:$8 sps:$4 sm:$0xff]   ;;  %v1371_v44 = vld [vmem:[#allocation5 + $0x2c0] ss:$8 sps:$4 sm:$0xff]  }
  0x57   :  { %753 = vmatprep.subr.bf16.mxu1 %v1311_v45  ;;  %v1376_v45 = vld [vmem:[#allocation5 + $0x2b4] ss:$8 sps:$4 sm:$0xff]  }
  0x59   :  { %711 = vmatpush2.bf16.msra.mxu0 %v1310_v48  ;;  %v1377_v48 = vld [vmem:[#allocation5 + $0x2a0] ss:$8 sps:$4 sm:$0xff]  }
  0x5a   :  { %712 = vmatprep.subr.bf16.mxu0 %v1314_v50  ;;  %754 = vmatpush2.bf16.msra.mxu1 %v1313_v51  ;;  %v1380_v50 = vld [vmem:[#allocation5 + $0x290] ss:$8 sps:$4 sm:$0xff]   ;;  %v1388_v51 = vld [vmem:[#allocation5 + $0x284] ss:$8 sps:$4 sm:$0xff]  }
  0x5b   :  { %755 = vmatprep.subr.bf16.mxu1 %v1317_v54  ;;  %v74_v54 = vld [vmem:[#allocation2 + $0x58] sm:$0xff] }
  0x5c   :  { %v81_v55 = vpack.c.bf16 %v74_v54, %v67_v53 }
  0x5d   :  { %713 = vmatpush2.bf16.msra.mxu0 %v1316_v56  ;;  %v1389_v56 = vld [vmem:[#allocation7 + $0x78] sm:$0xff]  }
  0x5e   :  { %714 = vmatprep.subr.bf16.mxu0 %v1320_v57  ;;  %756 = vmatpush2.bf16.msra.mxu1 %v1319_v58  ;;  %v1390_v57 = vld [vmem:[#allocation7 + $0x38] sm:$0xff]   ;;  %v1391_v58 = vld [vmem:[#allocation7 + $0x70] sm:$0xff]  }
  0x5f   :  { %757 = vmatprep.subr.bf16.mxu1 %v1323_v59  ;;  %v1392_v59 = vld [vmem:[#allocation7 + $0x30] sm:$0xff]  }
  0x61   :  { %715 = vmatpush2.bf16.msra.mxu0 %v1322_v60  ;;  %v1393_v60 = vld [vmem:[#allocation7 + $0x68] sm:$0xff]  }
  0x62   :  { %716 = vmatprep.subr.bf16.mxu0 %v1326_v61  ;;  %758 = vmatpush2.bf16.msra.mxu1 %v1325_v62  ;;  %v1394_v61 = vld [vmem:[#allocation7 + $0x28] sm:$0xff]   ;;  %v1395_v62 = vld [vmem:[#allocation7 + $0x60] sm:$0xff]  }
  0x63   :  { %759 = vmatprep.subr.bf16.mxu1 %v1329_v63  ;;  %v1396_v63 = vld [vmem:[#allocation7 + $0x20] sm:$0xff]  }
  0x65   :  { %717 = vmatpush2.bf16.msra.mxu0 %v1328_v0  ;;  %v1397_v0 = vld [vmem:[#allocation7 + $0x58] sm:$0xff]  }
  0x66   :  { %718 = vmatprep.subr.bf16.mxu0 %v1332_v2  ;;  %760 = vmatpush2.bf16.msra.mxu1 %v1331_v1  ;;  %v1398_v1 = vld [vmem:[#allocation7 + $0x18] sm:$0xff]   ;;  %v1399_v2 = vld [vmem:[#allocation7 + $0x50] sm:$0xff]  }
  0x67   :  { %761 = vmatprep.subr.bf16.mxu1 %v1335_v4  ;;  %v1401_v4 = vld [vmem:[#allocation7 + $0x48] sm:$0xff]  }
  0x69   :  { %719 = vmatpush2.bf16.msra.mxu0 %v1334_v3  ;;  %v1400_v3 = vld [vmem:[#allocation7 + $0x10] sm:$0xff]  }
  0x6a   :  { %774 = vmatprep.subr.bf16.mxu0 %v1340_v8  ;;  %762 = vmatpush2.bf16.msra.mxu1 %v1337_v6  ;;  %v1403_v6 = vld [vmem:[#allocation7 + $0x40] sm:$0xff]   ;;  %v184_v8 = vlaneseq }
  0x6b   :  { %831 = vmatprep.subr.bf16.mxu1 %v1385_v16 }
  0x6c   :  { %721 = vmatmul.mubr.bf16.vlgmr.msra.gmra.mxu0 %v77_v11  ;;  %v185_v10 = vshrl.u32 %v184_v8, 7 }
  0x6d   :  { %775 = vmatpush1.bf16.msra.mxu0 %v1338_v12  ;;  %764 = vmatmul.mubr.bf16.vlgmr.msra.gmra.mxu1 %v79_v13 }
  0x6e   :  { %776 = vmatprep.subr.bf16.mxu0 %v1343_v14  ;;  %849 = vmatprep.mubr.bf16.mxu1 %v1508_v21  ;;  %v186_v13 = vsub.s32 0, %v185_v10  ;;  %v190_v14 = vsub.s32 1, %v185_v10 }
  0x6f   :  { %832 = vmatpush1.bf16.msra.mxu1 %v1383_v15  ;;  %806 = vmatprep.mubr.bf16.mxu0 %v82_v26  ;;  %v182_v15 = vld [vmem:[%s1566_s2] sm:$0x3] }
  0x70   :  { %1209 = vmatprep.subr.bf16.mxu1 %v1389_v56  ;;  %v191_v19 = vrot.slane %v182_v15, %v190_v14 }
  0x71   :  { %777 = vmatpush1.bf16.msra.mxu0 %v1341_v17 }
  0x72   :  { %778 = vmatprep.subr.bf16.mxu0 %v1346_v18  ;;  %v187_v18 = vrot.slane %v182_v15, %v186_v13 }
  0x75   :  { %779 = vmatpush1.bf16.msra.mxu0 %v1344_v20  ;;  %1187 = vmatmul.mubr.msk.bf16.vlgmr.msra.gmra.mxu1 %vm684_vm0, %v83_v27 }
  0x76   :  { %780 = vmatprep.subr.bf16.mxu0 %v1349_v25  ;;  %1210 = vmatpush3.bf16.msra.mxu1 %v1390_v57 }
  0x77   :  { %1211 = vmatprep.subr.bf16.mxu1 %v1391_v58  ;;  %v1188_v58 = vld [vmem:[%s1568_s4] ss:$0 sm:$0xff] }
  0x79   :  { %781 = vmatpush1.bf16.msra.mxu0 %v1347_v28 }
  0x7a   :  { %782 = vmatprep.subr.bf16.mxu0 %v1352_v29  ;;  %1212 = vmatpush3.bf16.msra.mxu1 %v1392_v59 }
  0x7b   :  { %1213 = vmatprep.subr.bf16.mxu1 %v1393_v60 }
  0x7d   :  { %783 = vmatpush1.bf16.msra.mxu0 %v1350_v30 }
  0x7e   :  { %784 = vmatprep.subr.bf16.mxu0 %v1355_v31  ;;  %1214 = vmatpush3.bf16.msra.mxu1 %v1394_v61 }
  0x7f   :  { %1215 = vmatprep.subr.bf16.mxu1 %v1395_v62 }
  0x81   :  { %785 = vmatpush1.bf16.msra.mxu0 %v1353_v32 }
  0x82   :  { %786 = vmatprep.subr.bf16.mxu0 %v1358_v33  ;;  %1216 = vmatpush3.bf16.msra.mxu1 %v1396_v63 }
  0x83   :  { %1217 = vmatprep.subr.bf16.mxu1 %v1397_v0 }
  0x85   :  { %787 = vmatpush1.bf16.msra.mxu0 %v1356_v34 }
  0x86   :  { %788 = vmatprep.subr.bf16.mxu0 %v1361_v35  ;;  %1218 = vmatpush3.bf16.msra.mxu1 %v1398_v1 }
  0x87   :  { %1219 = vmatprep.subr.bf16.mxu1 %v1399_v2 }
  0x89   :  { %789 = vmatpush1.bf16.msra.mxu0 %v1359_v36 }
  0x8a   :  { %790 = vmatprep.subr.bf16.mxu0 %v1364_v37  ;;  %1220 = vmatpush3.bf16.msra.mxu1 %v1400_v3 }
  0x8b   :  { %1221 = vmatprep.subr.bf16.mxu1 %v1401_v4 }
  0x8d   :  { %791 = vmatpush2.bf16.msra.mxu0 %v1362_v38 }
  0x8e   :  { %792 = vmatprep.subr.bf16.mxu0 %v1367_v39  ;;  %1222 = vmatpush3.bf16.msra.mxu1 %v1402_v5 }
  0x8f   :  { %1223 = vmatprep.subr.bf16.mxu1 %v1403_v6 }
  0x91   :  { %793 = vmatpush2.bf16.msra.mxu0 %v1365_v40 }
  0x92   :  { %794 = vmatprep.subr.bf16.mxu0 %v1370_v41  ;;  %1224 = vmatpush3.bf16.msra.mxu1 %v1404_v7 }
  0x95   :  { %795 = vmatpush2.bf16.msra.mxu0 %v1368_v42 }
  0x96   :  { %796 = vmatprep.subr.bf16.mxu0 %v1373_v43 }
  0x99   :  { %797 = vmatpush2.bf16.msra.mxu0 %v1371_v44 }
  0x9a   :  { %798 = vmatprep.subr.bf16.mxu0 %v1376_v45 }
  0x9d   :  { %799 = vmatpush2.bf16.msra.mxu0 %v1374_v46 }
  0x9e   :  { %800 = vmatprep.subr.bf16.mxu0 %v1379_v47 }
  0xa1   :  { %801 = vmatpush2.bf16.msra.mxu0 %v1377_v48 }
  0xa2   :  { %802 = vmatprep.subr.bf16.mxu0 %v1382_v49 }
  0xa5   :  { %803 = vmatpush2.bf16.msra.mxu0 %v1380_v50 }
  0xa6   :  { %804 = vmatprep.subr.bf16.mxu0 %v1388_v51 }
  0xa9   :  { %805 = vmatpush2.bf16.msra.mxu0 %v1386_v52 }
  0xac   :  { %807 = vmatmul.mubr.bf16.vlgmr.msra.gmra.mxu0 %v81_v55 }
 0x12c   :  { %v722_v11 = vpop.f32.mrf.mxu0 }
 0x12d   :  { %v765_v9 = vpop.f32.mrf.mxu1  ;;  %v723_v22 = vadd.f32 %v722_v11, %v187_v18 }
 0x12e   :  { %v724_v16 = vpop.f32.mrf.mxu0 }
 0x12f   :  { %v767_v12 = vpop.f32.mrf.mxu1  ;;  %v725_v23 = vadd.f32 %v724_v16, %v191_v19  ;;  %v766_v28 = vadd.f32 %v765_v9, %v723_v22 }
 0x130   :  { %v726_v20 = vpop.f32.mrf.mxu0 }
 0x131   :  { %v769_v17 = vpop.f32.mrf.mxu1  ;;  %v727_v26 = vadd.f32 %v726_v20, %v187_v18  ;;  %v768_v29 = vadd.f32 %v767_v12, %v725_v23 }
 0x132   :  { %v728_v25 = vpop.f32.mrf.mxu0 }
 0x133   :  { %v771_v21 = vpop.f32.mrf.mxu1  ;;  %v729_v31 = vadd.f32 %v728_v25, %v191_v19  ;;  %v770_v33 = vadd.f32 %v769_v17, %v727_v26 }
 0x135   :  { %v851_v24 = vpop.f32.mrf.mxu1  ;;  %v772_v39 = vadd.f32 %v771_v21, %v729_v31 }
 0x137   :  { %v853_v30 = vpop.f32.mrf.mxu1 }
 0x139   :  { %v855_v37 = vpop.f32.mrf.mxu1 }
 0x13b   :  { %v857_v45 = vpop.f32.mrf.mxu1 }
 0x16c   :  { %v808_v27 = vpop.f32.mrf.mxu0 }
 0x16d   :  { %v809_v34 = vadd.f32 %v808_v27, %v766_v28 }
 0x16e   :  { %v810_v32 = vpop.f32.mrf.mxu0 }
 0x16f   :  { %v811_v35 = vadd.f32 %v810_v32, %v768_v29  ;;  %v852_v42 = vadd.f32 %v851_v24, %v809_v34 }
 0x170   :  { %v812_v36 = vpop.f32.mrf.mxu0 }
 0x171   :  { %v813_v38 = vadd.f32 %v812_v36, %v770_v33  ;;  %v854_v40 = vadd.f32 %v853_v30, %v811_v35  ;;  %v864_v49 = vmul.f32 0.01, %v852_v42  ;;  %vm860_vm3 = vcmp.gt.f32.partialorder %v852_v42, 0.0 }
 0x172   :  { %v814_v41 = vpop.f32.mrf.mxu0 }
 0x173   :  { %v856_v43 = vadd.f32 %v855_v37, %v813_v38  ;;  %v815_v44 = vadd.f32 %v814_v41, %v772_v39  ;;  %v865_v47 = vmul.f32 0.01, %v854_v40  ;;  %vm861_vm2 = vcmp.gt.f32.partialorder %v854_v40, 0.0 }
 0x174   :  { %v868_v54 = vsel %vm860_vm3, %v852_v42, %v864_v49 }
 0x175   :  { %v866_v46 = vmul.f32 0.01, %v856_v43  ;;  %vm862_vm1 = vcmp.gt.f32.partialorder %v856_v43, 0.0  ;;  %v858_v48 = vadd.f32 %v857_v45, %v815_v44  ;;  %v869_v52 = vsel %vm861_vm2, %v854_v40, %v865_v47 }
 0x177   :  { %vm863_vm4 = vcmp.gt.f32.partialorder %v858_v48, 0.0  ;;  %v867_v50 = vmul.f32 0.01, %v858_v48  ;;  %v870_v51 = vsel %vm862_vm1, %v856_v43, %v866_v46 }
 0x178   :  { %v872_v56 = vpack.c.bf16 %v870_v51, %v868_v54 }
 0x179   :  { %v871_v53 = vsel %vm863_vm4, %v858_v48, %v867_v50 }
 0x17a   :  { %v873_v55 = vpack.c.bf16 %v871_v53, %v869_v52 }
 0x17c   :  { %1041 = vmatprep.mubr.bf16.mxu1 %v873_v55 }
 0x17d   :  { %1042 = vmatmul.mubr.bf16.vlgmr.msra.gmra.mxu1 %v872_v56 }
 0x23d   :  { %v1225_v57 = vpop.f32.mrf.mxu1 }
 0x23f   :  { %v1226_v59 = vpop.f32.mrf.mxu1 }
 0x240   :  { %v1227_v60 = vadd.f32 %v1226_v59, %v1225_v57 }
 0x241   :  { %v1228_v61 = vpop.f32.mrf.mxu1 }
 0x242   :  { %v1044_v62 = vadd.f32 %v1227_v60, %v1188_v58 }
 0x243   :  { %v1229_v63 = vpop.f32.mrf.mxu1 }
 0x244   :  { %v1050_v0 = vsub.f32 0.0, %v1044_v62  ;;  %v1230_v1 = vadd.f32 %v1229_v63, %v1228_v61 }
 0x246   :  { %v1052_v2 = vmul.f32 1.442695, %v1050_v0  ;;  %v1047_v3 = vadd.f32 %v1230_v1, %v1188_v58 }
 0x248   :  { %1405 = vpow2.f32 %v1052_v2  ;;  %v1051_v4 = vsub.f32 0.0, %v1047_v3 }
 0x24a   :  { %v1054_v5 = vmul.f32 1.442695, %v1051_v4 }
 0x24c   :  { %1407 = vpow2.f32 %v1054_v5 }
 0x255   :  { %v1406_v6 = vpop.eup %1405 }
 0x256   :  { %v1056_v7 = vadd.f32 1.0, %v1406_v6 }
 0x258   :  { %1409 = vrcp.f32 %v1056_v7 }
 0x259   :  { %v1408_v8 = vpop.eup %1407 }
 0x25a   :  { %v1057_v9 = vadd.f32 1.0, %v1408_v8 }
 0x25c   :  { %1411 = vrcp.f32 %v1057_v9 }
 0x265   :  { %v1410_v10 = vpop.eup %1409 }
 0x266   :  { %v1207_v11 = vpack.c.bf16 %v1410_v10, %v1410_v10 }
 0x268   :  { %1069 = vst.msk [vmem:[#allocation8] sm:$0xf] %vm1068_vm5, %v1207_v11 }
 0x269   :  { %v1412_v12 = vpop.eup %1411 }
 0x26a   :  { %v1208_v13 = vpack.c.bf16 %v1412_v12, %v1412_v12 }
 0x26c   :  { %1070 = vst.msk [vmem:[#allocation8 + $0x4] sm:$0xf] %vm1068_vm5, %v1208_v13 }
 0x26d   :  { %1075 = vsyncadd [#allocation4], 64  ;;  %s1509_s4 = smov [#allocation8]  }
 0x26e   :  { %s1076_s15 = sshll.u32 %s1509_s4, 4  ;;  %s1077_s15 = int_to_ptr.vmem [resolvable:$true] %s1076_s15 }
 0x26f   :  { %s1473_s16 = scalar_lea.vmem %s1077_s15, 64  ;;  %s1477_s17 = scalar_lea.vmem %s1077_s15, 128 }
 0x270   :  { %p1474_p1 = scmp.ne.s32.totalorder %s1077_s15, %s1473_s16  ;;  %p1478_p2 = scmp.lt.s32.totalorder %s1077_s15, %s1077_s15 }
 0x271   :  { %p1479_p3 = scmp.lt.s32.totalorder %s1477_s17, %s1473_s16 }
 0x273   :  { %p1480_p4 = por %p1479_p3, %p1478_p2 }
 0x275   :  { %p1481_p5 = pnand %p1480_p4, %p1474_p1 }
 0x277   :  { %1484 = shalt.err (!%p1481_p5)
}
 0x278   :  { %1082 = dma.vmem_to_hbm [thread:$0]  %s1077_s15, 64, %s1569_s5, [#allocation4], %s1506_s10, %s1506_s10, %s1507_s11  }
 0x279   :  { %1497 = dma.done.wait [#allocation4], 128  }
 0x27a   :  { %1498 = vsyncadd [#allocation4], 4294967168 }
 0x27b   :  { %1086 = vsyncpa [#allocation3], 1 }
 0x27c   :  { %1087 = vsyncpa [#allocation6], 1 }
 0x27d   :  { %1088 = vsyncpa [#allocation4], 1 }

</bundles_post_ra>
